<compile_context>
chip_gen: v7x
topology: tpu7x:2x2x1
jax: 0.10.0
libtpu: 0.0.40
codegen_flags: <defaults>
</compile_context>

<pallas_src>
import functools

import jax
import jax.numpy as jnp
from jax import lax
from jax.experimental import pallas as pl
from jax.experimental.pallas import tpu as pltpu


@functools.lru_cache(maxsize=None)
def _roll_is_numpy_convention():
    """One-time cached probe of pltpu.roll's direction on this backend.

    Returns True iff pltpu.roll(x, s, axis) == np.roll(x, s, axis), i.e. a
    positive shift moves elements towards higher indices.  Keeps the main
    kernel's masks correct regardless of the rotate convention.
    """
    def probe(x_ref, o_ref):
        o_ref[...] = pltpu.roll(x_ref[...], 1, 1)

    x = jnp.arange(8 * 128, dtype=jnp.float32).reshape(8, 128)
    y = pl.pallas_call(
        probe, out_shape=jax.ShapeDtypeStruct((8, 128), jnp.float32))(x)
    y = jax.block_until_ready(y)
    return bool(y[0, 1] == x[0, 0])


def _spp_kernel(x_ref, o_ref, *, kernel_sizes, H, W, chunk, roll_fwd):
    """One grid step: pool a (block_c, H*W) lane-dense slab with every kernel.

    x_ref : (block_c, H*W)        input block (VMEM)
    o_ref : (1+K, block_c, H*W)   fused output block (VMEM)
    """
    L = H * W
    block_c = x_ref.shape[0]
    chunk = min(chunk, block_c)
    n_chunks = -(-block_c // chunk)
    neg = float("-inf")

    # Process kernel sizes smallest-first so the running W-direction max can be
    # shared; results still land in the output slot of the original ordering.
    order = sorted(range(len(kernel_sizes)), key=lambda i: kernel_sizes[i])

    def shift_amt(off):
        # Static roll amount such that roll(x, amt, 1)[..., i] == x[..., i+off]
        # for in-range i (wrapped positions are masked by the caller).
        return (-off) % L if roll_fwd else off % L

    # Lane-position helpers, hoisted: one iota + one mod per grid step.
    flat_idx = lax.broadcasted_iota(jnp.int32, (chunk, L), 1)
    w_idx = flat_idx % W

    def process(c0):
        x_c = x_ref[pl.ds(c0, chunk)]                       # (chunk, L), vregs
        o_ref[0, pl.ds(c0, chunk)] = x_c                    # identity feature

        row = x_c            # running max over the W window, vreg-resident
        prev_p = 0
        for oi in order:
            k = kernel_sizes[oi]
            p = k // 2
            # Grow the W-direction (lane-shift) running max from prev_p to p.
            for d in range(prev_p + 1, p + 1):
                rgt = pltpu.roll(x_c, shift_amt(+d), 1)         # x[h, w+d]
                row = jnp.maximum(row, jnp.where(w_idx < W - d, rgt, neg))
                lft = pltpu.roll(x_c, shift_amt(-d), 1)         # x[h, w-d]
                row = jnp.maximum(row, jnp.where(w_idx >= d, lft, neg))
            prev_p = p
            # H-direction (lane shift by dh*W) max over [-p, +p] of the row max.
            acc = row
            for dh in range(1, p + 1):
                dn = pltpu.roll(row, shift_amt(+dh * W), 1)     # row[h+dh, w]
                acc = jnp.maximum(acc, jnp.where(flat_idx < (H - dh) * W, dn, neg))
                up = pltpu.roll(row, shift_amt(-dh * W), 1)     # row[h-dh, w]
                acc = jnp.maximum(acc, jnp.where(flat_idx >= dh * W, up, neg))
            o_ref[1 + oi, pl.ds(c0, chunk)] = acc

    if n_chunks <= 8:
        # Short loop: emit straight-line code (full LLO scheduler visibility).
        starts, seen = [], set()
        for i in range(n_chunks):
            s = min(i * chunk, block_c - chunk)   # last chunk may overlap: safe
            if s not in seen:
                seen.add(s)
                starts.append(s)
        for s in starts:
            process(s)
    else:
        last = block_c - chunk
        divisible = (block_c % chunk == 0)

        def body(ci, carry):
            if divisible:
                c0 = pl.multiple_of(ci * chunk, chunk)
            else:
                c0 = jnp.minimum(ci * chunk, last)
            process(c0)
            return carry

        lax.fori_loop(0, n_chunks, body, 0)


def _choose_block_c(C, L, n_feats, itemsize, budget_bytes):
    """Largest channel block fitting the VMEM budget whose second-to-last block
    dim is 8-aligned (or equal to the full C)."""
    per_c = 2 * (1 + n_feats) * L * itemsize        # double-buffered in + out
    cap = max(1, int(budget_bytes) // per_c)
    if C <= cap or C < 8:
        return C
    cap8 = max(8, (cap // 8) * 8)
    # Prefer a multiple-of-8 divisor of C near the cap (no ragged edge block).
    lo = max(8, cap8 // 2)
    for d in range(min(cap8, (C // 8) * 8), lo - 1, -8):
        if C % d == 0:
            return d
    # Otherwise accept a ragged last block; Pallas masks the out-of-range edge.
    return min(cap8, (C // 8) * 8)


def spp_forward(x, kernel_sizes=(3, 5, 7), block_c=None, vmem_budget_bytes=24 << 20):
    """SPP forward: x (N, C, H, W) -> (N, C * (1 + len(kernel_sizes)), H, W)."""
    assert x.ndim == 4
    kernel_sizes = tuple(int(k) for k in kernel_sizes)
    assert len(kernel_sizes) >= 1
    assert all(k >= 1 and k % 2 == 1 for k in kernel_sizes), "kernel sizes must be odd"
    assert jnp.issubdtype(x.dtype, jnp.floating), \
        "-inf max-pool padding requires a floating dtype"

    N, C, H, W = x.shape
    K = len(kernel_sizes)
    n_feats = 1 + K
    L = H * W
    itemsize = x.dtype.itemsize

    if block_c is None:
        block_c = _choose_block_c(C, L, n_feats, itemsize, vmem_budget_bytes)
        # v7x has 2 TensorCores: make sure the "parallel" grid has >= 2 steps.
        if N * pl.cdiv(C, block_c) < 2 and block_c >= 16:
            block_c = max(8, ((block_c // 2 + 7) // 8) * 8)
    block_c = min(block_c, C)
    assert block_c == C or block_c % 8 == 0, (C, block_c)
    c_steps = pl.cdiv(C, block_c)

    # Per-chunk slab: ~16 KiB of input, rounded to full sublane (8) packing.
    chunk = max(1, min(block_c, (16 * 1024) // max(1, L * itemsize)))
    if block_c >= 8:
        chunk = max(8, (chunk // 8) * 8)
    chunk = min(chunk, block_c)

    roll_fwd = _roll_is_numpy_convention()
    kernel = functools.partial(
        _spp_kernel, kernel_sizes=kernel_sizes, H=H, W=W, chunk=chunk,
        roll_fwd=roll_fwd)

    # Double-buffered in + out blocks, plus headroom for Mosaic internals.
    block_bytes = 2 * (1 + n_feats) * block_c * L * itemsize
    vmem_limit = int(max(block_bytes + (4 << 20), 16 << 20))

    max_p = max(k // 2 for k in kernel_sizes)
    flops = int(2 * N * C * L * (2 * max_p + 2 * sum(k // 2 for k in kernel_sizes)))
    bytes_accessed = int((1 + n_feats) * N * C * L * itemsize)

    out = pl.pallas_call(
        kernel,
        out_shape=jax.ShapeDtypeStruct((N, n_feats, C, L), x.dtype),
        grid_spec=pltpu.PrefetchScalarGridSpec(
            num_scalar_prefetch=0,
            grid=(N, c_steps),
            in_specs=[
                pl.BlockSpec((None, block_c, L), lambda n, c: (n, c, 0)),
            ],
            out_specs=pl.BlockSpec((None, n_feats, block_c, L),
                                   lambda n, c: (n, 0, c, 0)),
        ),
        compiler_params=pltpu.CompilerParams(
            dimension_semantics=("parallel", "parallel"),
            vmem_limit_bytes=vmem_limit),
        cost_estimate=pl.CostEstimate(
            flops=flops, transcendentals=0, bytes_accessed=bytes_accessed),
    )(x.reshape(N, C, L))

    # (1+K, C) are adjacent dims -> merging them realizes torch.cat(dim=1)
    # ordering; (H*W) -> (H, W) split is likewise free for contiguous NCHW.
    return out.reshape(N, n_feats * C, H, W)


def _spp_reference(x, kernel_sizes=(3, 5, 7)):
    """Pure-JAX reference matching torch's MaxPool2d(k, stride=1, padding=k//2)."""
    feats = [x]
    for k in kernel_sizes:
        p = k // 2
        pooled = lax.reduce_window(
            x, -jnp.inf, lax.max,
            window_dimensions=(1, 1, k, k),
            window_strides=(1, 1, 1, 1),
            padding=[(0, 0), (0, 0), (p, p), (p, p)])
        feats.append(pooled)
    return jnp.concatenate(feats, axis=1)


if __name__ == "__main__":
    key = jax.random.PRNGKey(0)
    N, C, H, W = 2, 4, 16, 16
    kernel_sizes = (3, 5, 7)

    x = jax.random.normal(key, (N, C, H, W), dtype=jnp.float32)

    out = spp_forward(x, kernel_sizes)
    out = jax.block_until_ready(out)

    # sanity checks against the pure-JAX reference (max is exact -> bitwise match)
    ref = _spp_reference(x, kernel_sizes)
    assert out.shape == (N, C * (1 + len(kernel_sizes)), H, W), out.shape
    assert jnp.array_equal(out, ref), "mismatch vs reference"

    print("KERNEL_OK")
</pallas_src>

<mosaic_0001>
module attributes {stable_mosaic.version = 11 : i64} {
  func.func @probe(%arg0: memref<8x128xf32, #tpu.memory_space<vmem>>, %arg1: memref<8x128xf32, #tpu.memory_space<vmem>>) attributes {dimension_semantics = [], scalar_prefetch = 0 : i64, scratch_operands = 0 : i64, tpu.core_type = #tpu.core_type<tc>} {
    %c0 = arith.constant 0 : index
    %c0_0 = arith.constant 0 : index
    %0 = vector.load %arg0[%c0, %c0_0] : memref<8x128xf32, #tpu.memory_space<vmem>>, vector<8x128xf32>
    %c1_i32 = arith.constant 1 : i32
    %1 = tpu.dynamic_rotate %0 by %c1_i32 dim 1 : vector<8x128xf32>, i32 -> vector<8x128xf32>
    %c0_1 = arith.constant 0 : index
    %c0_2 = arith.constant 0 : index
    %2 = vector.load %arg1[%c0_1, %c0_2] : memref<8x128xf32, #tpu.memory_space<vmem>>, vector<8x128xf32>
    tpu.vector_store %arg1[%c0_1, %c0_2], %1 {strides = array<i32>} : memref<8x128xf32, #tpu.memory_space<vmem>>, vector<8x128xf32>,
    return
  }
}

</mosaic_0001>

<bundles_post_ra>
// kernel: tpu_custom_call.1
= control target key start
LH: loop header
LB: loop body
LE: loop exit
PB: predicated region body
PF: predicated region fallthrough
CT: control target
= control target key end

     0   :  { %6 = vsyncpa [#allocation3], 0  ;;  %s128_s0 = inlined_call_operand.hbm [shape: f32[8,128], index: 0, kind: input, shape index: {}]   ;;  %s129_s1 = inlined_call_operand.hbm [shape: f32[8,128], index: 1, kind: output, shape index: {}]  }
   0x1   :  { %7 = vsyncpa [#allocation4], 0  ;;  %s91_s6 = smov [#allocation2]   ;;  %s43_s10 = scalar_lea.hbm %s128_s0, 128 }
   0x2   :  { %s14_s7 = sshll.u32 %s91_s6, 4  ;;  %p44_p0 = scmp.ne.s32.totalorder %s128_s0, %s43_s10  ;;  %s15_s7 = int_to_ptr.vmem [resolvable:$true] %s14_s7 }
   0x3   :  { %p47_p1 = scmp.lt.u32.totalorder %s43_s10, %s128_s0 }
   0x5   :  { %p49_p2 = pnand %p47_p1, %p44_p0 }
   0x7   :  { %52 = shalt.err (!%p49_p2)
}
   0x8   :  { %s53_s15 = scalar_lea.vmem %s15_s7, 128  ;;  %p58_p4 = scmp.lt.s32.totalorder %s15_s7, %s15_s7 }
   0x9   :  { %p54_p3 = scmp.ne.s32.totalorder %s15_s7, %s53_s15  ;;  %p59_p5 = scmp.lt.s32.totalorder %s53_s15, %s53_s15 }
   0xb   :  { %p60_p6 = por %p59_p5, %p58_p4 }
   0xd   :  { %p61_p7 = pnand %p60_p6, %p54_p3 }
   0xf   :  { %64 = shalt.err (!%p61_p7)
}
  0x10   :  { %17 = dma.hbm_to_vmem [thread:$0]  %s128_s0, 128, %s15_s7, [#allocation3]  }
  0x11   :  { %87 = dma.done.wait [#allocation3], 128  }
  0x12   :  { %88 = vsyncadd [#allocation3], 4294967168  ;;  %v21_v0 = vld [vmem:[#allocation2] sm:$0xff]  ;;  %s92_s18 = smov 1   ;;  %s93_s19 = smov [#allocation5]  }
  0x13   :  { %22 = vrot.lane.b32.xlu0 %v21_v0, %s92_s18  ;;  %s31_s20 = sshll.u32 %s93_s19, 4  ;;  %s32_s20 = int_to_ptr.vmem [resolvable:$true] %s31_s20 }
  0x14   :  { %s65_s21 = scalar_lea.vmem %s32_s20, 128  ;;  %p70_p9 = scmp.lt.s32.totalorder %s32_s20, %s32_s20 }
  0x15   :  { %p66_p8 = scmp.ne.s32.totalorder %s32_s20, %s65_s21  ;;  %p71_p10 = scmp.lt.s32.totalorder %s65_s21, %s65_s21 }
  0x17   :  { %p72_p11 = por %p71_p10, %p70_p9 }
  0x19   :  { %p73_p12 = pnand %p72_p11, %p66_p8 }
  0x85   :  { %v23_v1 = vpop.permute.xlu0 %22 }
  0x86   :  { %24 = vst [vmem:[#allocation5] sm:$0xff] %v23_v1 }
  0x87   :  { %76 = shalt.err (!%p73_p12)
}
  0x88   :  { %s77_s0 = scalar_lea.hbm %s129_s1, 128 }
  0x89   :  { %p78_p13 = scmp.ne.s32.totalorder %s129_s1, %s77_s0  ;;  %p81_p0 = scmp.lt.u32.totalorder %s77_s0, %s129_s1 }
  0x8b   :  { %p83_p1 = pnand %p81_p0, %p78_p13 }
  0x8d   :  { %86 = shalt.err (!%p83_p1)
}
  0x8e   :  { %34 = dma.vmem_to_hbm [thread:$0]  %s32_s20, 128, %s129_s1, [#allocation4]  }
  0x8f   :  { %89 = dma.done.wait [#allocation4], 128  }
  0x90   :  { %90 = vsyncadd [#allocation4], 4294967168 }
  0x91   :  { %38 = vsyncpa [#allocation3], 1 }
  0x92   :  { %39 = vsyncpa [#allocation4], 1 }

</bundles_post_ra>
